<compile_context>
chip_gen: v7x
topology: tpu7x:2x2x1
jax: 0.10.0
libtpu: 0.0.40
codegen_flags: <defaults>
</compile_context>

<pallas_src>
import jax
import jax.numpy as jnp
from jax.experimental import pallas as pl
from jax.experimental.pallas import tpu as pltpu


def power_expansion_kernel(x_ref, w_ref, o_ref):
    """x_ref/o_ref: (tc, S) f32; w_ref: (C_pad, P) f32 (VMEM-resident, constant block)."""
    tc = x_ref.shape[0]
    n_powers = w_ref.shape[-1]

    ci = pl.program_id(1)                         # channel-tile index
    row0 = pl.multiple_of(ci * tc, tc)
    w = w_ref[pl.ds(row0, tc), :]                 # (tc, P) weights for this tile

    x = x_ref[...]                                # (tc, S)
    # Horner: sum_p w_p * x**p == x * (w_1 + x * (w_2 + ... + x * w_P))
    # (x == 0 -> out == 0, matching torch's exp(p * log(0)) = 0 path.)
    acc = w[:, n_powers - 1:n_powers]             # (tc, 1), broadcasts over lanes
    for p in range(n_powers - 2, -1, -1):
        acc = w[:, p:p + 1] + x * acc
    o_ref[...] = (x * acc).astype(o_ref.dtype)


def power_expansion(x, row_weights, *, target_block_bytes=1 << 20):
    """x: [B, C, H, W] (x >= 0), row_weights: [C, P] (RowWiseLinear weights squeezed)."""
    B, C, H, W = x.shape
    P = row_weights.shape[-1]
    S = H * W
    itemsize = jnp.dtype(x.dtype).itemsize

    x3 = x.reshape(B, C, S)

    # Lane-dense spatial slab: pad last dim to a multiple of 128 when needed.
    S_pad = pl.cdiv(S, 128) * 128

    # Channel tile: ~target_block_bytes per block, multiple of 8 rows (or full C).
    bytes_per_row = S_pad * itemsize
    max_rows = max(1, target_block_bytes // bytes_per_row)
    if max_rows >= C or C < 8:
        tc = C
    else:
        tc = max(8, (max_rows // 8) * 8)
    C_pad = pl.cdiv(C, tc) * tc

    if S_pad != S or C_pad != C:
        # Zero padding is exact: Horner at x=0 gives 0; padded channels use w=0.
        x3 = jnp.pad(x3, ((0, 0), (0, C_pad - C), (0, S_pad - S)))
    w = row_weights.astype(x.dtype)
    if C_pad != C:
        w = jnp.pad(w, ((0, C_pad - C), (0, 0)))

    block_bytes = tc * S_pad * itemsize
    # Double-buffered input + output blocks + resident weights, with headroom.
    vmem_limit = int(min(max(4 * block_bytes + C_pad * P * itemsize + (2 << 20),
                             16 << 20), 32 << 20))

    out3 = pl.pallas_call(
        power_expansion_kernel,
        out_shape=jax.ShapeDtypeStruct((B, C_pad, S_pad), x.dtype),
        grid_spec=pltpu.PrefetchScalarGridSpec(
            num_scalar_prefetch=0,
            grid=(B, C_pad // tc),
            in_specs=[
                pl.BlockSpec((None, tc, S_pad), lambda b, ci: (b, ci, 0)),  # activations
                pl.BlockSpec((C_pad, P), lambda b, ci: (0, 0)),             # resident weights
            ],
            out_specs=pl.BlockSpec((None, tc, S_pad), lambda b, ci: (b, ci, 0)),
        ),
        compiler_params=pltpu.CompilerParams(
            dimension_semantics=("parallel", "parallel"),
            vmem_limit_bytes=vmem_limit),
    )(x3, w)

    return out3[:, :C, :S].reshape(B, C, H, W)


if __name__ == "__main__":
    B, C, H, W = 2, 4, 16, 16
    P = 3  # out_powers

    key = jax.random.PRNGKey(0)
    kx, kw = jax.random.split(key)

    # Inputs must be >= 0 (module asserts x.min() >= 0).
    x = jax.random.uniform(kx, (B, C, H, W), jnp.float32, minval=0.05, maxval=2.0)

    # RowWiseLinear(height=C, width=P, out_width=1):
    #   weights shape [C, 1, P], init uniform(-sqrt(1/out_width), sqrt(1/out_width)) = U(-1, 1)
    rw_weights = jax.random.uniform(kw, (C, 1, P), jnp.float32, minval=-1.0, maxval=1.0)

    out = power_expansion(x, rw_weights[:, 0, :])
    jax.block_until_ready(out)

    # Pure-JAX reference of the exact PyTorch math.
    powers = jnp.arange(1, P + 1, dtype=jnp.float32)            # expansion (non-learnable)
    expanded = jnp.exp(jnp.log(x)[..., None] * powers)          # [B,C,H,W,P] == x**p
    ref = jnp.einsum("bchwp,cp->bchw", expanded, rw_weights[:, 0, :])
    assert out.shape == (B, C, H, W)
    assert jnp.allclose(out, ref, rtol=1e-5, atol=1e-5)

    print("KERNEL_OK")
</pallas_src>

<mosaic_0001>
module attributes {stable_mosaic.version = 11 : i64} {
  func.func @power_expansion_kernel(%arg0: i32, %arg1: i32, %arg2: memref<1x4x256xf32, #tpu.memory_space<vmem>>, %arg3: memref<4x3xf32, #tpu.memory_space<vmem>>, %arg4: memref<1x4x256xf32, #tpu.memory_space<vmem>>) attributes {dimension_semantics = [#tpu.dimension_semantics<parallel>, #tpu.dimension_semantics<parallel>], iteration_bounds = array<i64: 2, 1>, scalar_prefetch = 0 : i64, scratch_operands = 0 : i64, tpu.core_type = #tpu.core_type<tc>, window_params = [{transform_indices = @transform_0, window_bounds = array<i64: 1, 4, 256>}, {pipeline_mode = #tpu.pipeline_mode<synchronous>, transform_indices = @transform_1, window_bounds = array<i64: 4, 3>}, {transform_indices = @transform_2, window_bounds = array<i64: 1, 4, 256>}]} {
    %c4_i32 = arith.constant 4 : i32
    %0 = arith.muli %arg1, %c4_i32 : i32
    %1 = tpu.assume_multiple %0, 4 : i32
    %2 = arith.index_cast %1 : i32 to index
    %c0 = arith.constant 0 : index
    %3 = vector.load %arg3[%2, %c0] : memref<4x3xf32, #tpu.memory_space<vmem>>, vector<4x3xf32>
    %c0_0 = arith.constant 0 : index
    %c0_1 = arith.constant 0 : index
    %c0_2 = arith.constant 0 : index
    %4 = vector.load %arg2[%c0_0, %c0_1, %c0_2] : memref<1x4x256xf32, #tpu.memory_space<vmem>>, vector<1x4x256xf32>
    %5 = vector.shape_cast %4 : vector<1x4x256xf32> to vector<4x256xf32>
    %6 = vector.extract_strided_slice %3 {offsets = [0, 2], sizes = [4, 1], strides = [1, 1]} : vector<4x3xf32> to vector<4x1xf32>
    %7 = vector.extract_strided_slice %3 {offsets = [0, 1], sizes = [4, 1], strides = [1, 1]} : vector<4x3xf32> to vector<4x1xf32>
    %8 = vector.broadcast %6 : vector<4x1xf32> to vector<4x256xf32>
    %9 = arith.mulf %5, %8 : vector<4x256xf32>
    %10 = vector.broadcast %7 : vector<4x1xf32> to vector<4x256xf32>
    %11 = arith.addf %10, %9 : vector<4x256xf32>
    %12 = vector.extract_strided_slice %3 {offsets = [0, 0], sizes = [4, 1], strides = [1, 1]} : vector<4x3xf32> to vector<4x1xf32>
    %13 = arith.mulf %5, %11 : vector<4x256xf32>
    %14 = vector.broadcast %12 : vector<4x1xf32> to vector<4x256xf32>
    %15 = arith.addf %14, %13 : vector<4x256xf32>
    %16 = arith.mulf %5, %15 : vector<4x256xf32>
    %c0_3 = arith.constant 0 : index
    %c0_4 = arith.constant 0 : index
    %c0_5 = arith.constant 0 : index
    %17 = vector.load %arg4[%c0_3, %c0_4, %c0_5] : memref<1x4x256xf32, #tpu.memory_space<vmem>>, vector<1x4x256xf32>
    %18 = vector.shape_cast %17 : vector<1x4x256xf32> to vector<4x256xf32>
    %19 = vector.shape_cast %16 : vector<4x256xf32> to vector<1x4x256xf32>
    tpu.vector_store %arg4[%c0_3, %c0_4, %c0_5], %19 {strides = array<i32>} : memref<1x4x256xf32, #tpu.memory_space<vmem>>, vector<1x4x256xf32>,
    return
  }
  func.func @transform_0(%arg0: i32, %arg1: i32) -> (i32, i32, i32) {
    %c0_i32 = arith.constant 0 : i32
    %c0_i32_0 = arith.constant 0 : i32
    return %arg0, %arg1, %c0_i32 : i32, i32, i32
  }
  func.func @transform_1(%arg0: i32, %arg1: i32) -> (i32, i32) {
    %c0_i32 = arith.constant 0 : i32
    %c0_i32_0 = arith.constant 0 : i32
    %c0_i32_1 = arith.constant 0 : i32
    return %c0_i32, %c0_i32_0 : i32, i32
  }
  func.func @transform_2(%arg0: i32, %arg1: i32) -> (i32, i32, i32) {
    %c0_i32 = arith.constant 0 : i32
    %c0_i32_0 = arith.constant 0 : i32
    return %arg0, %arg1, %c0_i32 : i32, i32, i32
  }
}

</mosaic_0001>

<bundles_post_ra>
// kernel: tpu_custom_call.1
= control target key start
LH: loop header
LB: loop body
LE: loop exit
PB: predicated region body
PF: predicated region fallthrough
CT: control target
= control target key end

     0   :  { %7 = vsyncpa [#allocation3], 0  ;;  %s838_s0 = inlined_call_operand.hbm [shape: f32[2,4,256], index: 0, kind: input, shape index: {}]   ;;  %s839_s1 = inlined_call_operand.hbm [shape: f32[4,3], index: 1, kind: input, shape index: {}]   ;;  %s840_s2 = inlined_call_operand.hbm [shape: f32[2,4,256], index: 2, kind: output, shape index: {}]  }
   0x1   :  { %9 = vsyncpa [#allocation3 + $0x1], 0 }
   0x2   :  { %10 = vsyncpa [#allocation6], 0 }
   0x3   :  { %11 = vsyncpa [#allocation4], 0 }
   0x4   :  { %13 = vsyncpa [#allocation4 + $0x1], 0  ;;  %s618_s9 = smov 0   ;;  %s620_s10 = smov 0  }
   0x5   :  { %s622_s11 = smov 0   ;;  %s624_s12 = smov 0  }
   0x6   :  { %s626_s13 = smov 0   ;;  %s628_s14 = smov 0  }
   0x7 LB: > { %s350_s15 = sadd.s32 4294967295, %s594_s14   ;;  %s351_s16 = sadd.s32 4294967294, %s594_s14   ;;  %s594_s14 = sphi %s628_s14, %s19_s14   ;;  %s590_s13 = sphi %s626_s13, %s865_s13   ;;  %s586_s12 = sphi %s624_s12, %s864_s12   ;;  %s582_s11 = sphi %s622_s11, %s863_s11   ;;  %s578_s10 = sphi %s620_s10, %s862_s10   ;;  %s574_s9 = sphi %s618_s9, %s861_s9  }
   0x8   : > { %p53_p0 = scmp.ne.s32.totalorder %s578_s10, %s574_s9  ;;  %p652_p1 = scmp.eq.s32.totalorder %s350_s15, 0 }
   0x9   : > { %p656_p2 = scmp.eq.s32.totalorder %s350_s15, 1  ;;  %p106_p3 = scmp.eq.s32.totalorder %s351_s16, 1 }
   0xa   : > { %s845_s17 = scalar_select %p652_p1, 1, 0 }
   0xb   : > { %s846_s18 = scalar_select %p656_p2, 1, 0 }
   0xc   : > { %p662_p4 = por %p652_p1, %p53_p0  ;;  %p352_p5 = scmp.ge.s32.totalorder %s594_s14, 1 }
   0xd   : > { %p667_p6 = por %p106_p3, %p53_p0  ;;  %p113_p7 = scmp.lt.s32.totalorder %s594_s14, 3 }
   0xe   : > { %s847_s19 = scalar_select %p662_p4, 1, 0 }
   0xf   : > { %s848_s20 = scalar_select %p667_p6, 1, 0 }
  0x10   : > { %p672_p8 = pnand %p352_p5, %p113_p7  ;;  %s596_s22 = smov [#allocation5]  }
  0x11   : > { %s126_s23 = sshll.u32 %s596_s22, 4  ;;  %s31_s25 = sadd.s32 1, %s590_s13  ;;  %s127_s23 = int_to_ptr.vmem [resolvable:$true] %s126_s23 }
  0x12   : > { %s849_s21 = scalar_select %p672_p8, 1, 0 }
  0x13   : > { %p377_p10 = pneg %p672_p8  ;;  %s40_s26 = sadd.s32 1, %s582_s11 }
  0x14   : > { %p687_p12 = scmp.ge.s32.totalorder %s31_s25, 2  ;;  %s450_s30 = scalar_lea.hbm %s839_s1, 64 }
  0x15   : > { %p681_p11 = pnand %p377_p10, %p652_p1  ;;  %p451_p13 = scmp.ne.s32.totalorder %s839_s1, %s450_s30 }
  0x16   : > { %s851_s27 = scalar_select %p687_p12, 1, 0 }
  0x17   : > { %p452_p0 = pneg %p681_p11  ;;  %p457_p7 = scmp.lt.u32.totalorder %s450_s30, %s839_s1 }
  0x19   : > { %p453_p3 = pnand %p452_p0, %p451_p13 }
  0x1b   : > { %p454_p5 = pneg %p453_p3 }
  0x1d   : > { %p459_p10 = pnand %p457_p7, %p454_p5 }
  0x1f   : > { %462 = shalt.err (!%p459_p10)
}
  0x20   : > { %s463_s7 = scalar_lea.vmem %s127_s23, 64  ;;  %p471_p4 = scmp.lt.s32.totalorder %s127_s23, %s127_s23 }
  0x21   : > { %p464_p9 = scmp.ne.s32.totalorder %s127_s23, %s463_s7  ;;  %p472_p8 = scmp.lt.s32.totalorder %s463_s7, %s463_s7 }
  0x23   : > { %p466_p6 = pnand %p464_p9, %p452_p0  ;;  %p473_p2 = por %p472_p8, %p471_p4 }
  0x25   : > { %p467_p1 = pneg %p466_p6 }
  0x27   : > { %p474_p12 = pnand %p473_p2, %p467_p1 }
  0x29   : > { %477 = shalt.err (!%p474_p12)
}
  0x2a   : > { %380 = dma.hbm_to_vmem [thread:$0]  (!%p681_p11), %s839_s1, 64, %s127_s23, [#allocation6]  }
  0x2b   : > { %p852_p4 = scmp.ne.s32.totalorder %s851_s27, 0  ;;  %p47_p1 = scmp.ne.s32.totalorder %s582_s11, %s578_s10 }
  0x2c   : > { %p48_p2 = scmp.eq.s32.totalorder %s594_s14, 0  ;;  %p390_p6 = scmp.lt.s32.totalorder %s594_s14, 2 }
  0x2d   : > { %s867_s25 = smov (%p852_p4, %s31_s25), 0  ;;  %p853_p12 = scmp.ne.s32.totalorder %s846_s18, 0 }
  0x2e   : > { %s35_s16 = ssub.s32 %s590_s13, %s867_s25  ;;  %p49_p9 = por %p48_p2, %p47_p1 }
  0x2f   : > { %p38_p8 = scmp.eq.s32.totalorder %s35_s16, 0  ;;  %p719_p13 = por %p853_p12, %p47_p1 }
  0x30   : > { %s137_s24 = sand.u32 1, %s582_s11   ;;  %s367_s27 = sshll.u32 %s590_s13, 7 }
  0x31   : > { %s727_s28 = scalar_select %p38_p8, %s582_s11, %s40_s26  }
  0x32   : > { %s355_s23 = sshll.u32 %s137_s24, 3  ;;  %s733_s3 = scalar_lea.hbm %s838_s0, %s367_s27 }
  0x33   : > { %s141_s18 = scalar_lea.vmem [#allocation2], %s355_s23  ;;  %p737_p11 = pnand %p390_p6, %p49_p9 }
  0x34   : > { %s151_s4 = sshll.u32 %s141_s18, 4  ;;  %s138_s26 = scalar_lea.sflag [#allocation3], %s137_s24  ;;  %s735_s4 = int_to_ptr.vmem [resolvable:$true] %s151_s4 }
  0x35   : > { %s478_s6 = scalar_lea.hbm %s733_s3, 128  ;;  %p480_p3 = pneg %p737_p11 }
  0x36   : > { %p479_p0 = scmp.ne.s32.totalorder %s733_s3, %s478_s6  ;;  %s483_s15 = scalar_lea.hbm %s838_s0, 256 }
  0x37   : > { %p484_p10 = scmp.lt.u32.totalorder %s733_s3, %s838_s0  ;;  %p485_p4 = scmp.lt.u32.totalorder %s483_s15, %s478_s6 }
  0x38   : > { %p481_p5 = pnand %p480_p3, %p479_p0  ;;  %p487_p2 = scmp.lt.u32.totalorder %s478_s6, %s733_s3 }
  0x39   : > { %p486_p1 = por %p485_p4, %p484_p10 }
  0x3a   : > { %p482_p7 = pneg %p481_p5 }
  0x3b   : > { %p488_p6 = por %p487_p2, %p486_p1 }
  0x3d   : > { %p489_p8 = pnand %p488_p6, %p482_p7 }
  0x3f   : > { %492 = shalt.err (!%p489_p8)
}
  0x40   : > { %s493_s24 = scalar_lea.vmem %s735_s4, 128  ;;  %s597_s27 = smov [#allocation2]  }
  0x41   : > { %p494_p9 = scmp.ne.s32.totalorder %s735_s4, %s493_s24  ;;  %s498_s29 = sshll.u32 %s597_s27, 4  ;;  %s499_s29 = int_to_ptr.vmem [resolvable:$false] %s498_s29 }
  0x42   : > { %s500_s30 = scalar_lea.vmem %s499_s29, 256  ;;  %p501_p5 = scmp.lt.s32.totalorder %s735_s4, %s499_s29 }
  0x43   : > { %p496_p12 = pnand %p494_p9, %p480_p3  ;;  %p502_p10 = scmp.lt.s32.totalorder %s500_s30, %s493_s24 }
  0x45   : > { %p497_p0 = pneg %p496_p12  ;;  %p503_p4 = por %p502_p10, %p501_p5 }
  0x47   : > { %p504_p1 = pnand %p503_p4, %p497_p0 }
  0x49   : > { %507 = shalt.err (!%p504_p1)
}
  0x4a   : > { %384 = dma.hbm_to_vmem [thread:$0]  (!%p737_p11), %s733_s3, 128, %s735_s4, %s138_s26  }
  0x4b   : > { %p856_p7 = scmp.ne.s32.totalorder %s849_s21, 0 }
  0x4c   : > { %s769_s18 = sand.u32 (!%p856_p7), 1, %s578_s10   ;;  %p857_p3 = scmp.ne.s32.totalorder (!%p856_p7), %s847_s19, 0 }
  0x4d   : > { %160 = sbr.rel (%p856_p7) target bundleno = 252 (0xfc), region = 28  ;;  %s359_s6 = sshll.u32 (!%p856_p7), %s769_s18, 3 }
  0x4e   : > { %s163_s7 = scalar_lea.sflag (!%p856_p7), [#allocation3], %s769_s18  ;;  %s166_s8 = scalar_lea.vmem (!%p856_p7), [#allocation2], %s359_s6 }
  0x54   : > { %561 = dma.done.wait (%p857_p3), %s163_s7, 128  }
  0x55   : > { %563 = vsyncadd (%p857_p3), %s163_s7, 4294967168  ;;  %p858_p11 = scmp.ne.s32.totalorder %s845_s17, 0 }
  0x57   : > { %565 = dma.done.wait (%p858_p11), [#allocation6], 64  }
  0x58   : > { %567 = vsyncadd (%p858_p11), [#allocation6], 4294967232  ;;  %v598_v0 = vmov 2   ;;  %v599_v1 = vmov 0   ;;  %v193_v2 = vld [vmem:[#allocation5] sm:$0xf]  ;;  %v202_v6 = vlaneseq }
  0x59   : > { %446 = vset.pattern.permute.xlu0 %v598_v0  ;;  %448 = vset.pattern.permute.xlu1 %v599_v1  ;;  %v600_v3 = vmov 1   ;;  %v601_v4 = vmov 839922192   ;;  %v194_v11 = vld [vmem:[%s166_s8] sm:$0xff]  ;;  %s368_s17 = sshll.u32 %s586_s12, 7  ;;  %s190_s19 = scalar_lea.vmem [#allocation7], %s359_s6 }
  0x5a   : > { %197 = vperm.xlu0 %446, %v193_v2   ;;  %223 = vperm.xlu1 %448, %v193_v2   ;;  %v200_v5 = vunpack.c.l.s4 %v601_v4  ;;  %v203_v8 = vshrl.u32 %v202_v6, 7  ;;  %s254_s21 = sshll.u32 %s190_s19, 4  ;;  %s789_s5 = scalar_lea.hbm %s840_s2, %s368_s17  ;;  %s791_s21 = int_to_ptr.vmem [resolvable:$true] %s254_s21 }
  0x5b   : > { %s238_s26 = scalar_lea.sflag [#allocation4], %s769_s18  ;;  %s508_s15 = scalar_lea.vmem %s791_s21, 128 }
  0x5c   : > { %v201_v7 = vunpack.c.0.s8 %v200_v5  ;;  %p509_p2 = scmp.ne.s32.totalorder %s791_s21, %s508_s15  ;;  %s602_s12 = smov [#allocation7]  }
  0x5d   : > { %s512_s16 = sshll.u32 %s602_s12, 4  ;;  %s513_s16 = int_to_ptr.vmem [resolvable:$false] %s512_s16 }
  0x5e   : > { %447 = vset.pattern.permute.xlu0 %v600_v3  ;;  %v204_v9 = vsub.s32 %v201_v7, %v203_v8  ;;  %p510_p6 = pnand %p509_p2, %p719_p13  ;;  %s514_s23 = scalar_lea.vmem %s513_s16, 256 }
  0x5f   : > { %209 = vperm.xlu0 %447, %v193_v2   ;;  %p515_p9 = scmp.lt.s32.totalorder %s791_s21, %s513_s16  ;;  %p516_p12 = scmp.lt.s32.totalorder %s514_s23, %s508_s15 }
  0x60   : > { %p511_p8 = pneg %p510_p6 }
  0x61   : > { %p517_p0 = por %p516_p12, %p515_p9 }
  0x63   : > { %449 = vset.pattern.permute.xlu0 %v599_v1  ;;  %p518_p5 = pnand %p517_p0, %p511_p8 }
  0xd9   : > { %v198_v10 = vpop.permute.xlu0 %197  ;;  %v224_v20 = vpop.permute.xlu1 %223 }
  0xda   : > { %v205_v12 = vrot.slane %v198_v10, %v204_v9 }
  0xdc   : > { %v207_v13 = vmul.f32 %v205_v12, %v194_v11 }
  0xde   : > { %v213_v14 = vcombine.high %v207_v13, %v207_v13  ;;  %v210_v15 = vpop.permute.xlu0 %209 }
  0xdf   : > { %v215_v16 = vadd.f32 %v210_v15, %v207_v13 }
  0xe0   : > { %v216_v17 = vadd.f32 %v213_v14, %v210_v15 }
  0xe2   : > { %v219_v18 = vcombine.low %v215_v16, %v216_v17 }
  0xe4   : > { %v221_v19 = vmul.f32 %v219_v18, %v194_v11 }
  0xe6   : > { %v227_v21 = vcombine.high %v221_v19, %v221_v19  ;;  %v229_v22 = vadd.f32 %v224_v20, %v221_v19 }
  0xe8   : > { %v230_v23 = vadd.f32 %v227_v21, %v224_v20 }
  0xea   : > { %v233_v24 = vcombine.low %v229_v22, %v230_v23 }
  0xec   : > { %v235_v25 = vmul.f32 %v233_v24, %v194_v11 }
  0xee   : > { %236 = vst [vmem:[%s190_s19] sm:$0xff] %v235_v25 }
  0xef   : > { %521 = shalt.err (!%p518_p5)
}
  0xf0   : > { %s522_s24 = scalar_lea.hbm %s789_s5, 128  ;;  %s526_s30 = scalar_lea.hbm %s840_s2, 256 }
  0xf1   : > { %p523_p10 = scmp.ne.s32.totalorder %s789_s5, %s522_s24  ;;  %p527_p7 = scmp.lt.u32.totalorder %s789_s5, %s840_s2 }
  0xf2   : > { %p528_p3 = scmp.lt.u32.totalorder %s526_s30, %s522_s24  ;;  %p530_p2 = scmp.lt.u32.totalorder %s522_s24, %s789_s5 }
  0xf3   : > { %p524_p4 = pnand %p523_p10, %p719_p13 }
  0xf4   : > { %p529_p11 = por %p528_p3, %p527_p7 }
  0xf5   : > { %p525_p1 = pneg %p524_p4 }
  0xf6   : > { %p531_p6 = por %p530_p2, %p529_p11 }
  0xf8   : > { %p532_p8 = pnand %p531_p6, %p525_p1 }
  0xfa   : > { %535 = shalt.err (!%p532_p8)
}
  0xfb   : > { %375 = dma.vmem_to_hbm [thread:$0]  (%p719_p13), %s791_s21, 128, %s789_s5, %s238_s26  }
  0xfc PF: > { %s266_s7 = sand.u32 1, %s574_s9   ;;  %p859_p9 = scmp.ne.s32.totalorder %s848_s20, 0 }
  0xfd   : > { %p860_p12 = scmp.ge.s32.totalorder %s594_s14, 2  ;;  %s267_s8 = scalar_lea.sflag [#allocation4], %s266_s7 }
  0xff   : > { %p386_p0 = pnand %p860_p12, %p859_p9 }
 0x101   : > { %569 = dma.done.wait (!%p386_p0), %s267_s8, 128  }
 0x102   : > { %571 = vsyncadd (!%p386_p0), %s267_s8, 4294967168  ;;  %s19_s14 = sadd.s32 1, %s594_s14   ;;  %s861_s9 = smov %s578_s10 }
 0x103   : > { %p16_p5 = scmp.ge.s32.totalorder %s19_s14, 4   ;;  %s862_s10 = smov %s582_s11 }
 0x104   : > { %s863_s11 = smov %s727_s28  ;;  %s864_s12 = smov %s590_s13 }
 0x105   : > { %s865_s13 = smov %s867_s25  ;;  %18 = sbr.rel (!%p16_p5) target bundleno = 7 (0x7), region = 78 }
 0x10c   :  { %272 = vsyncpa [#allocation3], 1 }
 0x10d   :  { %274 = vsyncpa [#allocation3 + $0x1], 1 }
 0x10e   :  { %275 = vsyncpa [#allocation6], 1 }
 0x10f   :  { %276 = vsyncpa [#allocation4], 1 }
 0x110   :  { %278 = vsyncpa [#allocation4 + $0x1], 1 }

</bundles_post_ra>
